<compile_context>
chip_gen: v7x
topology: tpu7x:2x2x1
jax: 0.10.0
libtpu: 0.0.40
codegen_flags: <defaults>
</compile_context>

<pallas_src>
import numpy as np
import jax
import jax.numpy as jnp
from jax.experimental import pallas as pl
from jax.experimental.pallas import tpu as pltpu

K = 3
PAD = 1
_LANE = 128


def _conv_d312_kernel(x_ref, o_ref, carry_ref):
    # x_ref / o_ref: (BT, TH, W) blocks in VMEM.
    # carry_ref:     (BT, 1, W) scratch = last input row of the previous H tile.
    @pl.when(pl.program_id(1) == 0)
    def _():
        # First H tile of this image group: the row above is the zero pad row.
        carry_ref[...] = jnp.zeros_like(carry_ref)

    x = x_ref[...]
    # Rows 1..TH-1:  out[y] = x[y] - x[y-1]   (direct stores, no concat temporary)
    o_ref[:, 1:, :] = (x[:, 1:, :] - x[:, :-1, :]).astype(o_ref.dtype)
    # Row 0: subtract the carried row (zero on the first tile -> padding=1 border).
    o_ref[:, :1, :] = (x[:, :1, :] - carry_ref[...]).astype(o_ref.dtype)
    # Carry this tile's last row into the next H tile (sequential 'arbitrary' axis).
    carry_ref[...] = x[:, -1:, :].astype(carry_ref.dtype)


def _sublane(dtype):
    itemsize = jnp.dtype(dtype).itemsize
    return 8 * max(1, 4 // itemsize)  # f32 -> 8, bf16 -> 16, int8 -> 32


def _padded_tile_bytes(rows, W, dtype):
    # VMEM footprint of a (rows, W) slice, padded to the (sublane, 128) tiling.
    itemsize = jnp.dtype(dtype).itemsize
    sl = _sublane(dtype)
    rows_p = pl.cdiv(rows, sl) * sl
    w_p = pl.cdiv(W, _LANE) * _LANE
    return rows_p * w_p * itemsize


def _vmem_budget():
    # Generation-aware budget: v5e/v6e have 128 MiB physical VMEM, v7x only 64 MiB.
    # Leave headroom under the physical capacity and split across the
    # 2x double-buffered input + output blocks plus the carry scratch.
    try:
        vmem_cap = int(pltpu.get_tpu_info().vmem_capacity_bytes)
    except Exception:
        vmem_cap = 64 * 1024 * 1024  # conservative (v7x-sized) fallback
    vmem_limit = min((3 * vmem_cap) // 4, 96 * 1024 * 1024)
    per_buffer = vmem_limit // 6
    return vmem_limit, per_buffer


def conv_d312(x):
    """x: (N, 1, H, W). Returns F.conv2d(x, fixed Conv_d312 kernel, padding=1)."""
    N, C, H, W = x.shape
    assert C == 1, "Conv_d312 is a single-channel operator"
    B = N * C
    xb = x.reshape(B, H, W)
    itemsize = jnp.dtype(x.dtype).itemsize
    sl = _sublane(x.dtype)

    vmem_limit, per_buffer = _vmem_budget()

    # Tile sizing from the padded VMEM footprint, not logical bytes.
    image_bytes = _padded_tile_bytes(H, W, x.dtype)
    if image_bytes <= per_buffer:
        th = H                                          # whole image per block
        bt = max(1, min(B, per_buffer // image_bytes))  # as many images as fit
    else:
        # Large image: tile H (multiple of the sublane count) with a 1-row carry.
        bt = 1
        row_bytes = _padded_tile_bytes(1, W, x.dtype) // sl  # bytes per padded row
        rows_fit = per_buffer // max(1, row_bytes)
        th = max(sl, (rows_fit // sl) * sl)
        th = min(th, H)

    # Keep the parallel batch axis at >= 2 grid steps so both v7x TensorCores
    # get work (costs one extra ~0.35us step on single-TC chips -- negligible).
    if B >= 2:
        bt = min(bt, pl.cdiv(B, 2))

    grid = (pl.cdiv(B, bt), pl.cdiv(H, th))  # ragged last blocks handled by Pallas

    cost = pl.CostEstimate(
        flops=B * H * W,                          # one subtract per output element
        transcendentals=0,
        bytes_accessed=2 * B * H * W * itemsize,  # read x once, write out once
    )

    # TODO(synk): for real workloads where W is not a multiple of 128, present a
    # lane-dense (H, B*W) layout only if the transpose fuses with neighbouring
    # ops; a standalone extra HBM pass would cost more than it saves here.

    out = pl.pallas_call(
        _conv_d312_kernel,
        out_shape=jax.ShapeDtypeStruct((B, H, W), x.dtype),
        grid=grid,
        in_specs=[pl.BlockSpec((bt, th, W), lambda b, h: (b, h, 0))],
        out_specs=pl.BlockSpec((bt, th, W), lambda b, h: (b, h, 0)),
        scratch_shapes=[pltpu.VMEM((bt, 1, W), x.dtype)],
        compiler_params=pltpu.CompilerParams(
            dimension_semantics=("parallel", "arbitrary"),
            vmem_limit_bytes=vmem_limit,
        ),
        cost_estimate=cost,
    )(xb)

    return out.reshape(N, C, H, W)


def make_weight():
    # The module's fixed (non-learnable) 3x3 weights, for reference only;
    # the kernel constant-folds them (only the -1/+1 taps survive).
    kernel = np.zeros((K, K), dtype=np.float32)
    kernel[0, 1] = -1.0
    kernel[1, 1] = 1.0
    return jnp.asarray(kernel).reshape(1, 1, K, K)


if __name__ == "__main__":
    key = jax.random.PRNGKey(0)
    N, C, H, W = 2, 1, 16, 16          # Conv_d312 expects a single input channel
    x = jax.random.normal(key, (N, C, H, W), dtype=jnp.float32)

    out = conv_d312(x)
    out = jax.block_until_ready(out)

    # Reference: out[y, x] = x[y, x] - x[y-1, x]  (zero above the top edge),
    # identical to F.conv2d(x, make_weight(), padding=1).
    shifted = jnp.pad(x, ((0, 0), (0, 0), (PAD, 0), (0, 0)))[:, :, :H, :]
    ref = x - shifted
    assert out.shape == (N, C, H, W)
    np.testing.assert_allclose(np.asarray(out), np.asarray(ref), rtol=1e-5, atol=1e-5)

    print("KERNEL_OK")
</pallas_src>

<mosaic_0001>
module attributes {stable_mosaic.version = 11 : i64} {
  func.func @_conv_d312_kernel(%arg0: i32, %arg1: i32, %arg2: memref<1x16x16xf32, #tpu.memory_space<vmem>>, %arg3: memref<1x16x16xf32, #tpu.memory_space<vmem>>, %arg4: memref<1x1x16xf32, #tpu.memory_space<vmem>>) attributes {dimension_semantics = [#tpu.dimension_semantics<parallel>, #tpu.dimension_semantics<arbitrary>], iteration_bounds = array<i64: 2, 1>, scalar_prefetch = 0 : i64, scratch_operands = 1 : i64, tpu.core_type = #tpu.core_type<tc>, window_params = [{transform_indices = @transform_0, window_bounds = array<i64: 1, 16, 16>}, {transform_indices = @transform_1, window_bounds = array<i64: 1, 16, 16>}]} {
    %c0_i32 = arith.constant 0 : i32
    %0 = arith.cmpi eq, %arg1, %c0_i32 : i32
    %1 = arith.extui %0 : i1 to i32
    %c0_i32_0 = arith.constant 0 : i32
    %2 = arith.cmpi ne, %1, %c0_i32_0 : i32
    scf.if %2 {
      %cst = arith.constant 0.000000e+00 : f32
      %14 = vector.broadcast %cst : f32 to vector<1x1x16xf32>
      %c0_14 = arith.constant 0 : index
      %c0_15 = arith.constant 0 : index
      %c0_16 = arith.constant 0 : index
      %15 = vector.load %arg4[%c0_14, %c0_15, %c0_16] : memref<1x1x16xf32, #tpu.memory_space<vmem>>, vector<1x1x16xf32>
      tpu.vector_store %arg4[%c0_14, %c0_15, %c0_16], %14 {strides = array<i32>} : memref<1x1x16xf32, #tpu.memory_space<vmem>>, vector<1x1x16xf32>,
    } else {
    }
    %c0 = arith.constant 0 : index
    %c0_1 = arith.constant 0 : index
    %c0_2 = arith.constant 0 : index
    %3 = vector.load %arg2[%c0, %c0_1, %c0_2] : memref<1x16x16xf32, #tpu.memory_space<vmem>>, vector<1x16x16xf32>
    %4 = vector.extract_strided_slice %3 {offsets = [0, 1, 0], sizes = [1, 15, 16], strides = [1, 1, 1]} : vector<1x16x16xf32> to vector<1x15x16xf32>
    %5 = vector.extract_strided_slice %3 {offsets = [0, 0, 0], sizes = [1, 15, 16], strides = [1, 1, 1]} : vector<1x16x16xf32> to vector<1x15x16xf32>
    %6 = arith.subf %4, %5 : vector<1x15x16xf32>
    %c0_3 = arith.constant 0 : index
    %c1 = arith.constant 1 : index
    %c0_4 = arith.constant 0 : index
    %7 = vector.load %arg3[%c0_3, %c1, %c0_4] : memref<1x16x16xf32, #tpu.memory_space<vmem>>, vector<1x15x16xf32>
    tpu.vector_store %arg3[%c0_3, %c1, %c0_4], %6 {strides = array<i32>} : memref<1x16x16xf32, #tpu.memory_space<vmem>>, vector<1x15x16xf32>,
    %8 = vector.extract_strided_slice %3 {offsets = [0, 0, 0], sizes = [1, 1, 16], strides = [1, 1, 1]} : vector<1x16x16xf32> to vector<1x1x16xf32>
    %c0_5 = arith.constant 0 : index
    %c0_6 = arith.constant 0 : index
    %c0_7 = arith.constant 0 : index
    %9 = vector.load %arg4[%c0_5, %c0_6, %c0_7] : memref<1x1x16xf32, #tpu.memory_space<vmem>>, vector<1x1x16xf32>
    %10 = arith.subf %8, %9 : vector<1x1x16xf32>
    %c0_8 = arith.constant 0 : index
    %c0_9 = arith.constant 0 : index
    %c0_10 = arith.constant 0 : index
    %11 = vector.load %arg3[%c0_8, %c0_9, %c0_10] : memref<1x16x16xf32, #tpu.memory_space<vmem>>, vector<1x1x16xf32>
    tpu.vector_store %arg3[%c0_8, %c0_9, %c0_10], %10 {strides = array<i32>} : memref<1x16x16xf32, #tpu.memory_space<vmem>>, vector<1x1x16xf32>,
    %12 = vector.extract_strided_slice %3 {offsets = [0, 15, 0], sizes = [1, 1, 16], strides = [1, 1, 1]} : vector<1x16x16xf32> to vector<1x1x16xf32>
    %c0_11 = arith.constant 0 : index
    %c0_12 = arith.constant 0 : index
    %c0_13 = arith.constant 0 : index
    %13 = vector.load %arg4[%c0_11, %c0_12, %c0_13] : memref<1x1x16xf32, #tpu.memory_space<vmem>>, vector<1x1x16xf32>
    tpu.vector_store %arg4[%c0_11, %c0_12, %c0_13], %12 {strides = array<i32>} : memref<1x1x16xf32, #tpu.memory_space<vmem>>, vector<1x1x16xf32>,
    return
  }
  func.func @transform_0(%arg0: i32, %arg1: i32) -> (i32, i32, i32) {
    %c0_i32 = arith.constant 0 : i32
    %c0_i32_0 = arith.constant 0 : i32
    return %arg0, %arg1, %c0_i32 : i32, i32, i32
  }
  func.func @transform_1(%arg0: i32, %arg1: i32) -> (i32, i32, i32) {
    %c0_i32 = arith.constant 0 : i32
    %c0_i32_0 = arith.constant 0 : i32
    return %arg0, %arg1, %c0_i32 : i32, i32, i32
  }
}

</mosaic_0001>

<bundles_post_ra>
// kernel: tpu_custom_call.1
= control target key start
LH: loop header
LB: loop body
LE: loop exit
PB: predicated region body
PF: predicated region fallthrough
CT: control target
= control target key end

     0   :  { %6 = vsyncpa [#allocation4], 0  ;;  %s678_s0 = inlined_call_operand.hbm [shape: f32[2,16,16], index: 0, kind: input, shape index: {}]   ;;  %s679_s1 = inlined_call_operand.hbm [shape: f32[2,16,16], index: 1, kind: output, shape index: {}]  }
   0x1   :  { %8 = vsyncpa [#allocation4 + $0x1], 0 }
   0x2   :  { %9 = vsyncpa [#allocation5], 0 }
   0x3   :  { %11 = vsyncpa [#allocation5 + $0x1], 0  ;;  %s501_s6 = smov 0   ;;  %s503_s7 = smov 0  }
   0x4   :  { %s505_s8 = smov 0   ;;  %s507_s9 = smov 0  }
   0x5   :  { %s509_s10 = smov 0   ;;  %s511_s11 = smov 0  }
   0x6 LB: > { %s286_s12 = sadd.s32 4294967295, %s482_s11   ;;  %s287_s13 = sadd.s32 4294967294, %s482_s11   ;;  %s482_s11 = sphi %s511_s11, %s17_s11   ;;  %s478_s10 = sphi %s509_s10, %s694_s10   ;;  %s474_s9 = sphi %s507_s9, %s693_s9   ;;  %s470_s8 = sphi %s505_s8, %s692_s8   ;;  %s466_s7 = sphi %s503_s7, %s691_s7   ;;  %s462_s6 = sphi %s501_s6, %s690_s6  }
   0x7   : > { %s29_s14 = sadd.s32 1, %s478_s10  ;;  %s38_s15 = sadd.s32 1, %s470_s8 }
   0x8   : > { %p31_p0 = scmp.ge.s32.totalorder %s29_s14, 2  ;;  %p45_p1 = scmp.ne.s32.totalorder %s470_s8, %s466_s7 }
   0x9   : > { %p46_p2 = scmp.eq.s32.totalorder %s482_s11, 0  ;;  %p51_p3 = scmp.ne.s32.totalorder %s466_s7, %s462_s6 }
   0xa   : > { %s696_s14 = smov (%p31_p0, %s29_s14), 0  ;;  %p52_p5 = scmp.eq.s32.totalorder %s286_s12, 0 }
   0xb   : > { %p542_p4 = por %p46_p2, %p45_p1  ;;  %s33_s17 = ssub.s32 %s478_s10, %s696_s14 }
   0xc   : > { %p77_p6 = scmp.eq.s32.totalorder %s286_s12, 1  ;;  %p36_p7 = scmp.eq.s32.totalorder %s33_s17, 0 }
   0xd   : > { %p548_p8 = por %p52_p5, %p51_p3  ;;  %p83_p10 = scmp.eq.s32.totalorder %s287_s13, 1 }
   0xe   : > { %p552_p9 = por %p77_p6, %p45_p1  ;;  %p315_p13 = scmp.lt.s32.totalorder %s482_s11, 2 }
   0xf   : > { %s557_s20 = scalar_select %p36_p7, %s470_s8, %s38_s15  }
  0x10   : > { %s683_s19 = scalar_select %p552_p9, 1, 0 }
  0x11   : > { %p559_p11 = por %p83_p10, %p51_p3  ;;  %s103_s22 = sand.u32 1, %s470_s8  }
  0x12   : > { %s290_s23 = sshll.u32 %s103_s22, 4  ;;  %s301_s24 = sshll.u32 %s478_s10, 8 }
  0x13   : > { %s684_s21 = scalar_select %p559_p11, 1, 0 }
  0x14   : > { %s570_s27 = scalar_lea.hbm %s678_s0, %s301_s24  ;;  %s107_s28 = scalar_lea.vmem [#allocation3], %s290_s23 }
  0x15   : > { %s116_s29 = sshll.u32 %s107_s28, 4  ;;  %p576_p0 = pnand %p315_p13, %p542_p4  ;;  %s572_s29 = int_to_ptr.vmem [resolvable:$true] %s116_s29 }
  0x16   : > { %s581_s2 = scalar_lea.sflag [#allocation4], %s103_s22  ;;  %s370_s3 = scalar_lea.hbm %s570_s27, 256 }
  0x17   : > { %p371_p2 = scmp.ne.s32.totalorder %s570_s27, %s370_s3  ;;  %p372_p3 = pneg %p576_p0 }
  0x18   : > { %s375_s12 = scalar_lea.hbm %s678_s0, 512  ;;  %p376_p4 = scmp.lt.u32.totalorder %s570_s27, %s678_s0 }
  0x19   : > { %p373_p5 = pnand %p372_p3, %p371_p2  ;;  %p377_p7 = scmp.lt.u32.totalorder %s375_s12, %s370_s3 }
  0x1a   : > { %p379_p13 = scmp.lt.u32.totalorder %s370_s3, %s570_s27 }
  0x1b   : > { %p374_p6 = pneg %p373_p5  ;;  %p378_p10 = por %p377_p7, %p376_p4 }
  0x1d   : > { %p380_p12 = por %p379_p13, %p378_p10 }
  0x1f   : > { %p381_p1 = pnand %p380_p12, %p374_p6 }
  0x21   : > { %384 = shalt.err (!%p381_p1)
}
  0x22   : > { %s385_s16 = scalar_lea.vmem %s572_s29, 256  ;;  %s484_s17 = smov [#allocation3]  }
  0x23   : > { %p386_p2 = scmp.ne.s32.totalorder %s572_s29, %s385_s16  ;;  %s390_s22 = sshll.u32 %s484_s17, 4  ;;  %s391_s22 = int_to_ptr.vmem [resolvable:$false] %s390_s22 }
  0x24   : > { %s392_s23 = scalar_lea.vmem %s391_s22, 512  ;;  %p393_p9 = scmp.lt.s32.totalorder %s572_s29, %s391_s22 }
  0x25   : > { %p388_p5 = pnand %p386_p2, %p372_p3  ;;  %p394_p4 = scmp.lt.s32.totalorder %s392_s23, %s385_s16 }
  0x27   : > { %p389_p11 = pneg %p388_p5  ;;  %p395_p7 = por %p394_p4, %p393_p9 }
  0x29   : > { %p396_p10 = pnand %p395_p7, %p389_p11 }
  0x2b   : > { %399 = shalt.err (!%p396_p10)
}
  0x2c   : > { %s485_s24 = smov 128   ;;  %s486_s25 = smov 8  }
  0x2d   : > { %310 = dma.hbm_to_vmem [thread:$0]  (!%p576_p0), %s570_s27, 256, %s572_s29, %s581_s2, %s485_s24, %s485_s24, %s486_s25  }
  0x2e   : > { %p124_p12 = scmp.lt.s32.totalorder %s482_s11, 3  ;;  %p686_p1 = scmp.ge.s32.totalorder %s482_s11, 1 }
  0x30   : > { %p125_p3 = pnand %p686_p1, %p124_p12 }
  0x31   : > { %s613_s26 = sand.u32 (!%p125_p3), 1, %s466_s7  }
  0x32   : > { %128 = sbr.rel (%p125_p3) target bundleno = 85 (0x55), region = 24  ;;  %s294_s28 = sshll.u32 (!%p125_p3), %s613_s26, 4 }
  0x33   : > { %s131_s3 = scalar_lea.sflag (!%p125_p3), [#allocation4], %s613_s26  ;;  %s134_s4 = scalar_lea.vmem (!%p125_p3), [#allocation3], %s294_s28 }
  0x39   : > { %453 = dma.done.wait (%p548_p8), %s131_s3, 256  }
  0x3a   : > { %455 = vsyncadd (%p548_p8), %s131_s3, 4294967040  ;;  %vm159_vm0 = vcmask 122880   ;;  %v487_v0 = vmov 0.0   ;;  %vm181_vm1 = vcmask 130055   ;;  %v161_v1 = vld [vmem:[%s134_s4] sm:$0xff]  ;;  %s152_s27 = scalar_lea.vmem [#allocation6], %s294_s28 }
  0x3b   : > { %160 = vst.msk [vmem:[#allocation2] sm:$0x1] %vm159_vm0, %v487_v0  ;;  %s199_s29 = sshll.u32 %s152_s27, 4  ;;  %v162_v2 = vld [vmem:[%s134_s4 + $0x8] sm:$0xff]  ;;  %vm165_vm2 = vcmask 1040384   ;;  %s302_s30 = sshll.u32 %s474_s9, 8  ;;  %s623_s29 = int_to_ptr.vmem [resolvable:$true] %s199_s29 }
  0x3c   : > { %v166_v3 = vrot.slane %v161_v1, 7  ;;  %v167_v4 = vrot.slane %v162_v2, 7  ;;  %vm173_vm3 = vcmask 130049   ;;  %vm175_vm4 = vcmask 130048   ;;  %s628_s9 = scalar_lea.hbm %s679_s1, %s302_s30  ;;  %s184_s5 = scalar_lea.sflag [#allocation5], %s613_s26 }
  0x3d   : > { %s400_s12 = scalar_lea.vmem %s623_s29, 256  ;;  %p687_p9 = scmp.ne.s32.totalorder %s683_s19, 0 }
  0x3e   : > { %v171_v7 = vsub.f32 %v161_v1, %v166_v3  ;;  %v168_v8 = vsel %vm165_vm2, %v166_v3, %v167_v4  ;;  %p401_p8 = scmp.ne.s32.totalorder %s623_s29, %s400_s12  ;;  %s488_s13 = smov [#allocation6]  }
  0x3f   : > { %v172_v9 = vsub.f32 %v162_v2, %v168_v8  ;;  %s404_s15 = sshll.u32 %s488_s13, 4  ;;  %s405_s15 = int_to_ptr.vmem [resolvable:$false] %s404_s15 }
  0x40   : > { %174 = vst.msk [vmem:[%s152_s27] sm:$0xfe] %vm173_vm3, %v171_v7  ;;  %p402_p11 = pnand %p401_p8, %p687_p9  ;;  %s406_s16 = scalar_lea.vmem %s405_s15, 512 }
  0x41   : > { %176 = vst.msk [vmem:[%s152_s27 + $0x8] sm:$0xff] %vm175_vm4, %v172_v9  ;;  %p407_p6 = scmp.lt.s32.totalorder %s623_s29, %s405_s15  ;;  %p408_p13 = scmp.lt.s32.totalorder %s406_s16, %s400_s12 }
  0x42   : > { %v177_v5 = vld [vmem:[#allocation2] sm:$0x1]  ;;  %p403_p0 = pneg %p402_p11 }
  0x43   : > { %v178_v6 = vsub.f32 %v161_v1, %v177_v5  ;;  %182 = vst.msk [vmem:[#allocation2 - $0x7] sm:$0x80] %vm181_vm1, %v162_v2  ;;  %p409_p2 = por %p408_p13, %p407_p6 }
  0x45   : > { %180 = vst.msk [vmem:[%s152_s27] sm:$0x1] %vm159_vm0, %v178_v6  ;;  %p410_p5 = pnand %p409_p2, %p403_p0 }
  0x47   : > { %413 = shalt.err (!%p410_p5)
}
  0x48   : > { %s414_s17 = scalar_lea.hbm %s628_s9, 256  ;;  %s418_s24 = scalar_lea.hbm %s679_s1, 512 }
  0x49   : > { %p415_p4 = scmp.ne.s32.totalorder %s628_s9, %s414_s17  ;;  %p419_p12 = scmp.lt.u32.totalorder %s628_s9, %s679_s1 }
  0x4a   : > { %p420_p1 = scmp.lt.u32.totalorder %s418_s24, %s414_s17  ;;  %p422_p8 = scmp.lt.u32.totalorder %s414_s17, %s628_s9 }
  0x4b   : > { %p416_p7 = pnand %p415_p4, %p687_p9 }
  0x4c   : > { %p421_p3 = por %p420_p1, %p419_p12 }
  0x4d   : > { %p417_p10 = pneg %p416_p7 }
  0x4e   : > { %p423_p11 = por %p422_p8, %p421_p3 }
  0x50   : > { %p424_p0 = pnand %p423_p11, %p417_p10 }
  0x52   : > { %427 = shalt.err (!%p424_p0)
}
  0x53   : > { %s489_s3 = smov 128   ;;  %s490_s4 = smov 8  }
  0x54   : > { %305 = dma.vmem_to_hbm [thread:$0]  (%p687_p9), %s623_s29, 256, %s628_s9, %s184_s5, %s489_s3, %s489_s3, %s490_s4  }
  0x55 PF: > { %s214_s27 = sand.u32 1, %s462_s6   ;;  %p688_p6 = scmp.ne.s32.totalorder %s684_s21, 0 }
  0x56   : > { %p689_p13 = scmp.ge.s32.totalorder %s482_s11, 2  ;;  %s215_s30 = scalar_lea.sflag [#allocation5], %s214_s27 }
  0x58   : > { %p312_p2 = pnand %p689_p13, %p688_p6 }
  0x5a   : > { %457 = dma.done.wait (!%p312_p2), %s215_s30, 256  }
  0x5b   : > { %459 = vsyncadd (!%p312_p2), %s215_s30, 4294967040  ;;  %s17_s11 = sadd.s32 1, %s482_s11   ;;  %s690_s6 = smov %s466_s7 }
  0x5c   : > { %p14_p5 = scmp.ge.s32.totalorder %s17_s11, 4   ;;  %s691_s7 = smov %s470_s8 }
  0x5d   : > { %s692_s8 = smov %s557_s20  ;;  %s693_s9 = smov %s478_s10 }
  0x5e   : > { %s694_s10 = smov %s696_s14  ;;  %16 = sbr.rel (!%p14_p5) target bundleno = 6 (0x6), region = 73 }
  0x65   :  { %220 = vsyncpa [#allocation4], 1 }
  0x66   :  { %222 = vsyncpa [#allocation4 + $0x1], 1 }
  0x67   :  { %223 = vsyncpa [#allocation5], 1 }
  0x68   :  { %225 = vsyncpa [#allocation5 + $0x1], 1 }

</bundles_post_ra>
